<compile_context>
chip_gen: v5e
topology: v5e:2x2
jax: 0.10.0
libtpu: 0.0.40
codegen_flags: <defaults>
</compile_context>

<pallas_src>
import functools

import jax
import jax.numpy as jnp
from jax.experimental import pallas as pl
from jax.experimental.pallas import tpu as pltpu

EPS = 1e-05


# -----------------------------------------------------------------------------
# One-off probe: determine pltpu.roll's rotation convention on this backend.
# np.roll convention means roll(x, s, ax)[i] == x[(i - s) % n].
# -----------------------------------------------------------------------------
@functools.lru_cache(maxsize=None)
def _roll_matches_numpy() -> bool:
    def probe(x_ref, o_ref):
        o_ref[...] = pltpu.roll(x_ref[...], 1, 1)

    x = jax.lax.broadcasted_iota(jnp.int32, (8, 128), 1)
    out = pl.pallas_call(
        probe, out_shape=jax.ShapeDtypeStruct((8, 128), jnp.int32))(x)
    v = int(out[0, 0])
    if v == 127:
        return True
    if v == 1:
        return False
    raise RuntimeError(f"unexpected pltpu.roll probe value: {v}")


# -----------------------------------------------------------------------------
# Fused Pallas kernel (one grid step == `bt` images, channels-first (C, H*W))
# -----------------------------------------------------------------------------
def _make_revlb_kernel(hw, width, bt, c12, c6, c8, roll_sign):
    # tap index k = ky*3 + kx ; ConvTranspose2d(k=3,s=1,p=1):
    #   out[:, p] = sum_k W[k] @ z[:, p + s_k],  s_k = (1-ky)*width + (1-kx)
    shifts = tuple((1 - ky) * width + (1 - kx)
                   for ky in range(3) for kx in range(3))

    def relu_bn(v, s, b):
        # ConvT -> ReLU -> BatchNorm (eval) folded to per-channel affine, fp32.
        return jnp.maximum(v, 0.0) * s + b

    def conv3x3_t(z_f32, w9, masks):
        """9-tap transposed conv on a channels-first (Cin, HW) image.

        Shifts are lane rolls (XLU).  The per-tap validity mask (out-of-image
        rows/cols + roll wrap-around) is applied to the fp32 tap output: it
        commutes with the channel contraction and keeps all elementwise work
        in f32 (no bf16 VPU path needed on v5e)."""
        cout = w9.shape[1]
        acc = jnp.zeros((cout, hw), jnp.float32)
        for k, s in enumerate(shifts):
            t = z_f32 if s == 0 else pltpu.roll(z_f32, (roll_sign * s) % hw, 1)
            part = jnp.dot(w9[k], t.astype(jnp.bfloat16),
                           preferred_element_type=jnp.float32)
            if s != 0:
                part = part * masks[k:k + 1, :]
            acc = acc + part
        return acc

    def kernel(x_ref, cat_ref, m_ref,
               wsq_ref, bsq_ref,
               wfx_ref, wfc_ref, sf_ref, bf_ref,
               w23_ref, s2_ref, b2_ref, s3a_ref, b3a_ref,
               w3b_ref, s3b_ref, b3b_ref,
               out_ref):
        # resident (constant-index) inputs: load once per grid step.
        masks = m_ref[...]                                  # (9, HW) f32
        wsq, bsq = wsq_ref[...], bsq_ref[...]
        wfx, wfc = wfx_ref[...], wfc_ref[...]
        sf, bfh = sf_ref[...], bf_ref[...]
        w23, s2, b2 = w23_ref[...], s2_ref[...], b2_ref[...]
        s3a, b3a = s3a_ref[...], b3a_ref[...]
        w3b, s3b, b3b = w3b_ref[...], s3b_ref[...], b3b_ref[...]

        for b in range(bt):                                 # images in this tile
            x = x_ref[b]                                    # (Cx,   HW) bf16
            cat = cat_ref[b]                                # (5*Co, HW) bf16

            # squish: Conv3d(out, out, (5,1,1), bias=True) == matmul over (Co,5).
            cs = jnp.dot(wsq, cat, preferred_element_type=jnp.float32) + bsq

            # fused 1x1 branch heads; comb = [x ; cat_s] is never materialized.
            pre = (jnp.dot(wfx, x, preferred_element_type=jnp.float32)
                   + jnp.dot(wfc, cs.astype(jnp.bfloat16),
                             preferred_element_type=jnp.float32))
            z123 = relu_bn(pre, sf, bfh)                    # (3*c12, HW) f32

            y1 = z123[:c12]                                 # b1 (pre final ReLU)
            z23 = z123[c12:]                                # [b2 head ; b3 head]

            # b2's 3x3 conv and b3's first 3x3 conv, fused (block-diag taps).
            acc23 = conv3x3_t(z23, w23, masks)              # (c6+c8, HW) f32
            y2 = relu_bn(acc23[:c6], s2, b2)
            z3 = relu_bn(acc23[c6:], s3a, b3a)

            # b3's second 3x3 conv.
            y3 = relu_bn(conv3x3_t(z3, w3b, masks), s3b, b3b)

            # final ReLU (Dropout2d p=0 == identity).  Per-branch sublane-slice
            # stores at full 256-lane width: unmasked vst, no lane repacking.
            out_ref[b, :c12, :] = jnp.maximum(y1, 0.0).astype(out_ref.dtype)
            out_ref[b, c12:c12 + c6, :] = jnp.maximum(y2, 0.0).astype(out_ref.dtype)
            out_ref[b, c12 + c6:, :] = jnp.maximum(y3, 0.0).astype(out_ref.dtype)

    return kernel


def _pick_batch_tile(n):
    """Largest divisor of n (<= 8) that still leaves >= 2 grid steps (v7x)."""
    if n < 4:
        return 1
    best = 1
    for bt in range(2, min(8, n // 2) + 1):
        if n % bt == 0:
            best = bt
    return best


# -----------------------------------------------------------------------------
# Wrapper: reshape-only layout glue, weight/mask packing, pallas_call.
# -----------------------------------------------------------------------------
def revlb_forward(x_nchw, cat_ncdhw, params):
    """revLB forward.  x: (N, Cx, H, W), cat_in: (N, Co, 5, H, W) -> NCHW f32."""
    return _revlb_jit(x_nchw, cat_ncdhw, params,
                      roll_numpy=_roll_matches_numpy())


@functools.partial(jax.jit, static_argnames=("roll_numpy",))
def _revlb_jit(x_nchw, cat_ncdhw, params, *, roll_numpy):
    n, cx, h, w = x_nchw.shape
    co, d = cat_ncdhw.shape[1], cat_ncdhw.shape[2]
    if d != 5:
        raise ValueError("squish Conv3d k=(5,1,1) + squeeze(2) requires depth == 5")
    in_size = cx + co
    c12, c6, c8, c4 = in_size // 12, in_size // 6, in_size // 8, in_size // 4
    ct = c12 + c6 + c4
    hw = h * w
    bt = _pick_batch_tile(n)

    # Channels-first (C, H*W): contiguous reshapes only, NO HBM transposes.
    # (In a full bf16 network the casts below also disappear.)
    x2 = x_nchw.reshape(n, cx, hw).astype(jnp.bfloat16)
    cat2 = cat_ncdhw.reshape(n, co * 5, hw).astype(jnp.bfloat16)

    # Per-tap validity masks (dy/dx out of image + roll wrap), built once.
    yy = jnp.arange(hw, dtype=jnp.int32) // w
    xx = jnp.arange(hw, dtype=jnp.int32) % w
    masks = jnp.stack([
        (((yy + (1 - ky)) >= 0) & ((yy + (1 - ky)) < h)
         & ((xx + (1 - kx)) >= 0) & ((xx + (1 - kx)) < w)).astype(jnp.float32)
        for ky in range(3) for kx in range(3)])                     # (9, HW)

    bcast = lambda a: a.astype(jnp.bfloat16)
    # Fused 1x1 heads, split into x / cat_s column blocks.
    wf = jnp.concatenate([params['b1_w'], params['b2_w1'], params['b3_w1']], axis=0)
    wfx, wfc = bcast(wf[:, :cx]), bcast(wf[:, cx:])
    sf = jnp.concatenate([params['b1_s'], params['b2_s1'], params['b3_s1']], axis=0)
    bf = jnp.concatenate([params['b1_b'], params['b2_b1'], params['b3_b1']], axis=0)
    # Block-diagonal fused tap stack for (b2 conv | b3 first conv).
    w23 = bcast(jnp.concatenate([
        jnp.concatenate([params['b2_w2'],
                         jnp.zeros((9, c6, c12), params['b2_w2'].dtype)], axis=2),
        jnp.concatenate([jnp.zeros((9, c8, c12), params['b3_w2'].dtype),
                         params['b3_w2']], axis=2)], axis=1))       # (9, c6+c8, 2*c12)
    wsq, bsq = bcast(params['wsq']), params['bsq']
    w3b = bcast(params['b3_w3'])
    s2, b2 = params['b2_s2'], params['b2_b2']
    s3a, b3a = params['b3_s2'], params['b3_b2']
    s3b, b3b = params['b3_s3'], params['b3_b3']

    res2 = lambda a: pl.BlockSpec(a.shape, lambda i: (0, 0))        # resident
    res3 = lambda a: pl.BlockSpec(a.shape, lambda i: (0, 0, 0))     # resident

    flops = 2 * n * hw * (co * (5 * co) + (3 * c12) * in_size
                          + 9 * ((c6 + c8) * (2 * c12) + c4 * c8))
    bytes_accessed = int(
        x2.size * 2 + cat2.size * 2 + n * hw * ct * 4 + masks.size * 4
        + 2 * (wsq.size + wfx.size + wfc.size + w23.size + w3b.size)
        + 4 * (bsq.size + sf.size + bf.size + s2.size + b2.size
               + s3a.size + b3a.size + s3b.size + b3b.size))

    # NOTE: output kept f32 to match the PyTorch module; switch out_shape to
    # bfloat16 if the downstream consumer accepts it (halves the writeback).
    out = pl.pallas_call(
        _make_revlb_kernel(hw, w, bt, c12, c6, c8,
                           roll_sign=-1 if roll_numpy else 1),
        out_shape=jax.ShapeDtypeStruct((n, ct, hw), jnp.float32),
        grid=(n // bt,),
        in_specs=[
            pl.BlockSpec((bt, cx, hw), lambda i: (i, 0, 0)),
            pl.BlockSpec((bt, co * 5, hw), lambda i: (i, 0, 0)),
            res2(masks),
            res2(wsq), res2(bsq),
            res2(wfx), res2(wfc), res2(sf), res2(bf),
            res3(w23), res2(s2), res2(b2), res2(s3a), res2(b3a),
            res3(w3b), res2(s3b), res2(b3b),
        ],
        out_specs=pl.BlockSpec((bt, ct, hw), lambda i: (i, 0, 0)),
        compiler_params=pltpu.CompilerParams(
            dimension_semantics=("parallel",),          # batch across TCs on v7x
            vmem_limit_bytes=32 * 1024 * 1024),
        cost_estimate=pl.CostEstimate(flops=flops, transcendentals=0,
                                      bytes_accessed=bytes_accessed),
    )(x2, cat2, masks, wsq, bsq, wfx, wfc, sf, bf,
      w23, s2, b2, s3a, b3a, w3b, s3b, b3b)

    return out.reshape(n, ct, h, w)                     # NCHW, no transpose


# -----------------------------------------------------------------------------
# Pure-JAX fp32 reference (independent 2-D padded-shift implementation)
# -----------------------------------------------------------------------------
def _shift2d(z, dy, dx):
    """result[..., y, x] = z[..., y+dy, x+dx]; zero outside the image."""
    _, _, h, w = z.shape
    pads = ((0, 0), (0, 0), (max(-dy, 0), max(dy, 0)), (max(-dx, 0), max(dx, 0)))
    zp = jnp.pad(z, pads)
    return zp[:, :, max(dy, 0):max(dy, 0) + h, max(dx, 0):max(dx, 0) + w]


def _convt3_ref(z, w9):
    out = 0.0
    for ky in range(3):
        for kx in range(3):
            out = out + jnp.einsum('oi,nihw->nohw', w9[ky * 3 + kx],
                                   _shift2d(z, 1 - ky, 1 - kx))
    return out


def ref_forward(x_nchw, cat_ncdhw, p):
    n, _, h, w = x_nchw.shape
    co = cat_ncdhw.shape[1]
    cat = cat_ncdhw.reshape(n, co * 5, h, w)

    def relu_bn(v, s, b):
        return (jnp.maximum(v, 0.0) * s.reshape(1, -1, 1, 1)
                + b.reshape(1, -1, 1, 1))

    cs = jnp.einsum('oi,nihw->nohw', p['wsq'], cat) + p['bsq'].reshape(1, co, 1, 1)
    comb = jnp.concatenate([x_nchw, cs], axis=1)
    c1x1 = lambda wt, z: jnp.einsum('oi,nihw->nohw', wt, z)

    y1 = relu_bn(c1x1(p['b1_w'], comb), p['b1_s'], p['b1_b'])
    y2 = relu_bn(c1x1(p['b2_w1'], comb), p['b2_s1'], p['b2_b1'])
    y2 = relu_bn(_convt3_ref(y2, p['b2_w2']), p['b2_s2'], p['b2_b2'])
    y3 = relu_bn(c1x1(p['b3_w1'], comb), p['b3_s1'], p['b3_b1'])
    y3 = relu_bn(_convt3_ref(y3, p['b3_w2']), p['b3_s2'], p['b3_b2'])
    y3 = relu_bn(_convt3_ref(y3, p['b3_w3']), p['b3_s3'], p['b3_b3'])
    return jnp.maximum(jnp.concatenate([y1, y2, y3], axis=1), 0.0)


# -----------------------------------------------------------------------------
# Deterministic synthetic parameters (shapes follow the module __init__).
# Weights stored output-major: 1x1 as (Cout, Cin); 3x3 tap stacks (9, Cout, Cin)
# with tap k = ky*3 + kx  (== torch ConvTranspose2d weight[:, :, ky, kx].T).
# BatchNorm (eval) folded to per-channel affine (C, 1).
# -----------------------------------------------------------------------------
def _bn_affine(key, c):
    k1, k2, k3, k4 = jax.random.split(key, 4)
    gamma = jax.random.uniform(k1, (c,), minval=0.8, maxval=1.2)
    beta = 0.1 * jax.random.normal(k2, (c,))
    mean = 0.1 * jax.random.normal(k3, (c,))
    var = jax.random.uniform(k4, (c,), minval=0.5, maxval=1.5)
    scale = gamma / jnp.sqrt(var + EPS)
    bias = beta - mean * scale
    return (scale.reshape(c, 1).astype(jnp.float32),
            bias.reshape(c, 1).astype(jnp.float32))


def init_params(key, in_size, out_size):
    co = out_size
    c12, c6, c8, c4 = in_size // 12, in_size // 6, in_size // 8, in_size // 4
    ks = list(jax.random.split(key, 14))

    def wgt(k, shape, fan_in):
        v = jax.random.normal(k, shape, jnp.float32) / jnp.sqrt(jnp.float32(fan_in))
        return v.astype(jnp.bfloat16).astype(jnp.float32)   # bf16-exact weights

    p = {}
    # squish: Conv3d(out, out, (5,1,1), bias=True) folded to (Co, Co*5);
    # column index = ci*5 + d, matching cat_in.reshape(n, Co*5, H*W).
    p['wsq'] = wgt(ks[0], (co, co * 5), co * 5)
    p['bsq'] = (0.1 * jax.random.normal(ks[1], (co, 1))).astype(jnp.float32)
    p['b1_w'] = wgt(ks[2], (c12, in_size), in_size)
    p['b1_s'], p['b1_b'] = _bn_affine(ks[3], c12)
    p['b2_w1'] = wgt(ks[4], (c12, in_size), in_size)
    p['b2_s1'], p['b2_b1'] = _bn_affine(ks[5], c12)
    p['b2_w2'] = wgt(ks[6], (9, c6, c12), 9 * c12)
    p['b2_s2'], p['b2_b2'] = _bn_affine(ks[7], c6)
    p['b3_w1'] = wgt(ks[8], (c12, in_size), in_size)
    p['b3_s1'], p['b3_b1'] = _bn_affine(ks[9], c12)
    p['b3_w2'] = wgt(ks[10], (9, c8, c12), 9 * c12)
    p['b3_s2'], p['b3_b2'] = _bn_affine(ks[11], c8)
    p['b3_w3'] = wgt(ks[12], (9, c4, c8), 9 * c8)
    p['b3_s3'], p['b3_b3'] = _bn_affine(ks[13], c4)
    return p


if __name__ == "__main__":
    # in_size = x-channels + out_size, must be divisible by 24 (module req.)
    in_size, out_size = 96, 48
    n, h, w = 2, 16, 16             # >= 2 parallel grid steps (v7x megacore)
    cx = in_size - out_size

    key = jax.random.PRNGKey(0)
    kx, kc, kp = jax.random.split(key, 3)
    # bf16-representable inputs so the kernel's bf16 boundary cast is exact;
    # only in-kernel intermediate bf16 rounding differs from the fp32 reference.
    x = jax.random.normal(kx, (n, cx, h, w), jnp.float32)
    x = x.astype(jnp.bfloat16).astype(jnp.float32)
    cat_in = jax.random.normal(kc, (n, out_size, 5, h, w), jnp.float32)
    cat_in = cat_in.astype(jnp.bfloat16).astype(jnp.float32)
    params = init_params(kp, in_size, out_size)

    out = jax.block_until_ready(revlb_forward(x, cat_in, params))

    ref = ref_forward(x, cat_in, params)
    ct = in_size // 12 + in_size // 6 + in_size // 4
    assert out.shape == (n, ct, h, w) and out.dtype == jnp.float32
    # tolerance covers bf16 rounding of in-kernel intermediates vs fp32 ref.
    if not jnp.allclose(out, ref, atol=5e-2, rtol=5e-2):
        max_err = float(jnp.max(jnp.abs(out - ref)))
        raise RuntimeError(
            f"Pallas kernel mismatch vs JAX reference (max abs err={max_err:.4f})")
    print("KERNEL_OK")
</pallas_src>

<mosaic_0001>
module attributes {stable_mosaic.version = 11 : i64} {
  func.func @probe(%arg0: memref<8x128xi32, #tpu.memory_space<vmem>>, %arg1: memref<8x128xi32, #tpu.memory_space<vmem>>) attributes {dimension_semantics = [], scalar_prefetch = 0 : i64, scratch_operands = 0 : i64, tpu.core_type = #tpu.core_type<tc>} {
    %c0 = arith.constant 0 : index
    %c0_0 = arith.constant 0 : index
    %0 = vector.load %arg0[%c0, %c0_0] : memref<8x128xi32, #tpu.memory_space<vmem>>, vector<8x128xi32>
    %c1_i32 = arith.constant 1 : i32
    %1 = tpu.dynamic_rotate %0 by %c1_i32 dim 1 : vector<8x128xi32>, i32 -> vector<8x128xi32>
    %c0_1 = arith.constant 0 : index
    %c0_2 = arith.constant 0 : index
    %2 = vector.load %arg1[%c0_1, %c0_2] : memref<8x128xi32, #tpu.memory_space<vmem>>, vector<8x128xi32>
    tpu.vector_store %arg1[%c0_1, %c0_2], %1 {strides = array<i32>} : memref<8x128xi32, #tpu.memory_space<vmem>>, vector<8x128xi32>,
    return
  }
}

</mosaic_0001>

<bundles_post_ra>
// kernel: tpu_custom_call.1
= control target key start
LH: loop header
LB: loop body
LE: loop exit
PB: predicated region body
PF: predicated region fallthrough
CT: control target
= control target key end

     0   :  { %6 = vsyncpa [#allocation3], 0  ;;  %s118_s0 = inlined_call_operand.hbm [shape: s32[8,128], index: 0, kind: input, shape index: {}]   ;;  %s119_s1 = inlined_call_operand.hbm [shape: s32[8,128], index: 1, kind: output, shape index: {}]  }
   0x1   :  { %7 = vsyncpa [#allocation4], 0  ;;  %s13_s8 = sshll.u32 %s118_s0, 4  ;;  %s99_s9 = smov [#allocation2]   ;;  %s14_s8 = int_to_ptr.hbm [resolvable:$true] %s13_s8 }
   0x2   :  { %s15_s10 = sshll.u32 %s99_s9, 4  ;;  %s16_s10 = int_to_ptr.vmem [resolvable:$true] %s15_s10 }
   0x3   :  { %18 = dma.hbm_to_vmem [thread:$0]  %s14_s8, 128, %s16_s10, [#allocation3]  }
   0x4   :  { %95 = dma.done.wait [#allocation3], 128  }
   0x5   :  { %96 = vsyncadd [#allocation3], 4294967168  ;;  %v23_v0 = vld [vmem:[#allocation2] sm:$0xff]  ;;  %s100_s11 = smov 1   ;;  %s101_s12 = smov [#allocation5]  }
   0x6   :  { %24 = vrot.lane.b32.xlu0 %v23_v0, %s100_s11  ;;  %s32_s13 = sshll.u32 %s101_s12, 4  ;;  %s34_s16 = sshll.u32 %s119_s1, 4  ;;  %s33_s13 = int_to_ptr.vmem [resolvable:$true] %s32_s13  ;;  %s35_s16 = int_to_ptr.hbm [resolvable:$true] %s34_s16 }
  0x78   :  { %v25_v1 = vpop.permute.xlu0 %24 }
  0x79   :  { %26 = vst [vmem:[#allocation5] sm:$0xff] %v25_v1 }
  0x7a   :  { %37 = dma.vmem_to_hbm [thread:$0]  %s33_s13, 128, %s35_s16, [#allocation4]  }
  0x7b   :  { %97 = dma.done.wait [#allocation4], 128  }
  0x7c   :  { %98 = vsyncadd [#allocation4], 4294967168 }
  0x7d   :  { %42 = vsyncpa [#allocation3], 1 }
  0x7e   :  { %43 = vsyncpa [#allocation4], 1 }

</bundles_post_ra>
